<compile_context>
chip_gen: v5e
topology: v5e:2x2
jax: 0.10.0
libtpu: 0.0.40
codegen_flags: <defaults>
</compile_context>

<pallas_src>
import jax
import jax.numpy as jnp
from jax import lax
from jax.experimental import pallas as pl
from jax.experimental.pallas import tpu as pltpu


_VMEM_LIMIT = 32 * 1024 * 1024  # safe on v5e/v6e (128 MiB) and v7x (64 MiB / TC)


def _contract_last(a, b):
    """a: [m, k] @ b: [n, k] (PyTorch nn.Linear weight layout) -> [m, n] in f32.

    The MXU consumes either operand order via dot_general; no transpose is
    materialized in HBM or routed through the XLU.
    """
    return lax.dot_general(
        a, b,
        dimension_numbers=(((1,), (1,)), ((), ())),
        preferred_element_type=jnp.float32)


# ----------------------------------------------------------------------------
# Standalone tiled Linear + Tanh  (used by sae_forward / sae_reconstruct)
# ----------------------------------------------------------------------------
def _linear_tanh_kernel(x_ref, w_ref, b_ref, o_ref, acc_ref):
    # x_ref:(tm,tk)  w_ref:(tn,tk)  b_ref:(1,tn)  o_ref:(tm,tn)  acc_ref:(tm,tn) f32
    k = pl.program_id(2)

    @pl.when(k == 0)
    def _():
        acc_ref[...] = jnp.zeros_like(acc_ref)

    acc_ref[...] += _contract_last(x_ref[...], w_ref[...])

    @pl.when(k == pl.num_programs(2) - 1)
    def _():
        o_ref[...] = jnp.tanh(acc_ref[...] + b_ref[...]).astype(o_ref.dtype)


def linear_tanh(x, weight, bias, *, tm=128, tn=128, tk=128):
    """y = tanh(x @ weight.T + bias) with weight in PyTorch [d_out, d_in] layout."""
    B, d_in = x.shape
    d_out, d_in_w = weight.shape
    assert d_in == d_in_w
    tm, tn, tk = min(tm, B), min(tn, d_out), min(tk, d_in)
    assert B % tm == 0 and d_out % tn == 0 and d_in % tk == 0, (
        "demo kernel requires tile-divisible shapes")
    b2 = bias.reshape(1, d_out)
    grid = (B // tm, d_out // tn, d_in // tk)

    cost = pl.CostEstimate(
        flops=2 * B * d_in * d_out,
        transcendentals=B * d_out,
        bytes_accessed=4 * (x.size + weight.size + bias.size + B * d_out))

    return pl.pallas_call(
        _linear_tanh_kernel,
        out_shape=jax.ShapeDtypeStruct((B, d_out), x.dtype),
        grid_spec=pltpu.PrefetchScalarGridSpec(
            num_scalar_prefetch=0,
            grid=grid,
            in_specs=[
                pl.BlockSpec((tm, tk), lambda i, j, k: (i, k)),   # x
                pl.BlockSpec((tn, tk), lambda i, j, k: (j, k)),   # weight [d_out, d_in]
                pl.BlockSpec((1, tn), lambda i, j, k: (0, j)),    # bias
            ],
            out_specs=pl.BlockSpec((tm, tn), lambda i, j, k: (i, j)),
            scratch_shapes=[pltpu.VMEM((tm, tn), jnp.float32)],
        ),
        compiler_params=pltpu.CompilerParams(
            dimension_semantics=("parallel", "parallel", "arbitrary"),
            vmem_limit_bytes=_VMEM_LIMIT),
        cost_estimate=cost,
    )(x, weight, b2)


def sae_forward(x, w_forward, b_forward):
    """Pallas equivalent of SAutoEncoder.forward (inference path): returns y."""
    return linear_tanh(x, w_forward, b_forward)


def sae_reconstruct(y, w_backward, b_backward):
    """Pallas equivalent of SAutoEncoder.reconstruct."""
    return linear_tanh(y, w_backward, b_backward)


# ----------------------------------------------------------------------------
# Fused forward + reconstruct (training-path evaluation) in ONE pallas_call.
# Grid = (batch tiles [parallel], d_in reduction tiles [arbitrary, last]).
# Stage 1 accumulates y = tanh(x @ Wf^T + bf) over K tiles into an f32 scratch;
# stage 2 runs on the VMEM-resident y tile (no HBM round-trip of y).
# ----------------------------------------------------------------------------
def _fused_sae_kernel(x_ref, wf_ref, bf_ref, wb_ref, bb_ref,
                      y_ref, xr_ref, acc_ref):
    k = pl.program_id(1)

    @pl.when(k == 0)
    def _():
        acc_ref[...] = jnp.zeros_like(acc_ref)

    # Stage 1 partial sum: acc += x_tile @ Wf_tile^T (PyTorch layout, no transpose).
    acc_ref[...] += _contract_last(x_ref[...], wf_ref[...])

    @pl.when(k == pl.num_programs(1) - 1)
    def _():
        y = jnp.tanh(acc_ref[...] + bf_ref[...])
        y_ref[...] = y.astype(y_ref.dtype)
        # Stage 2 on the VMEM-resident y tile: x_rec = tanh(y @ Wb^T + bb).
        xr = _contract_last(y, wb_ref[...])
        xr_ref[...] = jnp.tanh(xr + bb_ref[...]).astype(xr_ref.dtype)


def sae_forward_and_reconstruct(x, w_forward, b_forward, w_backward, b_backward,
                                *, tm=64, tk=128):
    """One fused pallas_call returning (y, x_reconstruct).

    Matches the training-mode forward() math (the SGD parameter update side
    effect is intentionally omitted; see TODO at top of file).
    """
    B, d_in = x.shape
    d_out = w_forward.shape[0]
    assert w_forward.shape == (d_out, d_in)
    assert w_backward.shape == (d_in, d_out)
    tm, tk = min(tm, B), min(tk, d_in)
    assert B % tm == 0 and d_in % tk == 0, "demo kernel requires tile-divisible shapes"

    bf2 = b_forward.reshape(1, d_out)
    bb2 = b_backward.reshape(1, d_in)
    grid = (B // tm, d_in // tk)

    cost = pl.CostEstimate(
        flops=2 * B * d_in * d_out * 2,
        transcendentals=B * (d_out + d_in),
        bytes_accessed=4 * (x.size + w_forward.size + w_backward.size
                            + b_forward.size + b_backward.size
                            + B * d_out + B * d_in))

    return pl.pallas_call(
        _fused_sae_kernel,
        out_shape=(jax.ShapeDtypeStruct((B, d_out), x.dtype),
                   jax.ShapeDtypeStruct((B, d_in), x.dtype)),
        grid_spec=pltpu.PrefetchScalarGridSpec(
            num_scalar_prefetch=0,
            grid=grid,
            in_specs=[
                pl.BlockSpec((tm, tk), lambda i, k: (i, k)),       # x tile
                pl.BlockSpec((d_out, tk), lambda i, k: (0, k)),    # Wf [d_out, d_in]
                pl.BlockSpec((1, d_out), lambda i, k: (0, 0)),     # bf (resident)
                pl.BlockSpec((d_in, d_out), lambda i, k: (0, 0)),  # Wb (resident)
                pl.BlockSpec((1, d_in), lambda i, k: (0, 0)),      # bb (resident)
            ],
            out_specs=[
                pl.BlockSpec((tm, d_out), lambda i, k: (i, 0)),    # y
                pl.BlockSpec((tm, d_in), lambda i, k: (i, 0)),     # x_reconstruct
            ],
            scratch_shapes=[pltpu.VMEM((tm, d_out), jnp.float32)],
        ),
        compiler_params=pltpu.CompilerParams(
            dimension_semantics=("parallel", "arbitrary"),
            vmem_limit_bytes=_VMEM_LIMIT),
        cost_estimate=cost,
    )(x, w_forward, bf2, w_backward, bb2)


# ----------------------------------------------------------------------------
# Demo / self-test
# ----------------------------------------------------------------------------
def _init_linear(key, out_features, in_features):
    """Deterministic PyTorch-style nn.Linear init: U(-1/sqrt(in), 1/sqrt(in))."""
    kw, kb = jax.random.split(key)
    bound = 1.0 / jnp.sqrt(jnp.asarray(in_features, jnp.float32))
    w = jax.random.uniform(kw, (out_features, in_features), jnp.float32,
                           minval=-bound, maxval=bound)
    b = jax.random.uniform(kb, (out_features,), jnp.float32,
                           minval=-bound, maxval=bound)
    return w, b


if __name__ == "__main__":
    key = jax.random.PRNGKey(0)
    k_x, k_fwd, k_bwd = jax.random.split(key, 3)

    # Small but lane/sublane-friendly SAE sizes (multiples of 8 / 128) so all
    # matmul operands and outputs are lane-dense and the tiled grid runs >1 step.
    batch = 128
    input_size = 256
    output_size = 128

    x = jax.random.normal(k_x, (batch, input_size), jnp.float32)
    w_f, b_f = _init_linear(k_fwd, output_size, input_size)   # forward_pass Linear
    w_b, b_b = _init_linear(k_bwd, input_size, output_size)   # backward_pass Linear

    # Fused training-path evaluation: one kernel launch, y never leaves VMEM
    # between the two stages.
    y, x_rec = sae_forward_and_reconstruct(x, w_f, b_f, w_b, b_b)
    y = jax.block_until_ready(y)
    x_rec = jax.block_until_ready(x_rec)

    # Inference-only paths (single tiled Linear+Tanh each).
    y_only = jax.block_until_ready(sae_forward(x, w_f, b_f))
    x_rec2 = jax.block_until_ready(sae_reconstruct(y_only, w_b, b_b))

    # Plain-JAX references (same math as nn.Linear + Tanh).
    y_ref = jnp.tanh(x @ w_f.T + b_f)
    x_rec_ref = jnp.tanh(y_ref @ w_b.T + b_b)

    assert y.shape == (batch, output_size)
    assert x_rec.shape == (batch, input_size)
    assert jnp.allclose(y, y_ref, atol=5e-4, rtol=5e-4)
    assert jnp.allclose(y_only, y_ref, atol=5e-4, rtol=5e-4)
    assert jnp.allclose(x_rec, x_rec_ref, atol=1e-3, rtol=1e-3)
    assert jnp.allclose(x_rec2, x_rec_ref, atol=1e-3, rtol=1e-3)

    print("KERNEL_OK")
</pallas_src>

<mosaic_0001>
module attributes {stable_mosaic.version = 11 : i64} {
  func.func @_fused_sae_kernel(%arg0: i32, %arg1: i32, %arg2: memref<64x128xf32, #tpu.memory_space<vmem>>, %arg3: memref<128x128xf32, #tpu.memory_space<vmem>>, %arg4: memref<1x128xf32, #tpu.memory_space<vmem>>, %arg5: memref<256x128xf32, #tpu.memory_space<vmem>>, %arg6: memref<1x256xf32, #tpu.memory_space<vmem>>, %arg7: memref<64x128xf32, #tpu.memory_space<vmem>>, %arg8: memref<64x256xf32, #tpu.memory_space<vmem>>, %arg9: memref<64x128xf32, #tpu.memory_space<vmem>>) attributes {dimension_semantics = [#tpu.dimension_semantics<parallel>, #tpu.dimension_semantics<arbitrary>], iteration_bounds = array<i64: 2, 2>, scalar_prefetch = 0 : i64, scratch_operands = 1 : i64, tpu.core_type = #tpu.core_type<tc>, window_params = [{transform_indices = @transform_0, window_bounds = array<i64: 64, 128>}, {transform_indices = @transform_1, window_bounds = array<i64: 128, 128>}, {pipeline_mode = #tpu.pipeline_mode<synchronous>, transform_indices = @transform_2, window_bounds = array<i64: 1, 128>}, {pipeline_mode = #tpu.pipeline_mode<synchronous>, transform_indices = @transform_3, window_bounds = array<i64: 256, 128>}, {pipeline_mode = #tpu.pipeline_mode<synchronous>, transform_indices = @transform_4, window_bounds = array<i64: 1, 256>}, {transform_indices = @transform_5, window_bounds = array<i64: 64, 128>}, {transform_indices = @transform_6, window_bounds = array<i64: 64, 256>}]} {
    %c0_i32 = arith.constant 0 : i32
    %0 = arith.cmpi eq, %arg1, %c0_i32 : i32
    %1 = arith.extui %0 : i1 to i32
    %c0_i32_0 = arith.constant 0 : i32
    %2 = arith.cmpi ne, %1, %c0_i32_0 : i32
    scf.if %2 {
      %cst_9 = arith.constant 0.000000e+00 : f32
      %12 = vector.broadcast %cst_9 : f32 to vector<64x128xf32>
      %c0_10 = arith.constant 0 : index
      %c0_11 = arith.constant 0 : index
      %13 = vector.load %arg9[%c0_10, %c0_11] : memref<64x128xf32, #tpu.memory_space<vmem>>, vector<64x128xf32>
      tpu.vector_store %arg9[%c0_10, %c0_11], %12 {strides = array<i32>} : memref<64x128xf32, #tpu.memory_space<vmem>>, vector<64x128xf32>,
    } else {
    }
    %c0 = arith.constant 0 : index
    %c0_1 = arith.constant 0 : index
    %3 = vector.load %arg9[%c0, %c0_1] : memref<64x128xf32, #tpu.memory_space<vmem>>, vector<64x128xf32>
    %c0_2 = arith.constant 0 : index
    %c0_3 = arith.constant 0 : index
    %4 = vector.load %arg2[%c0_2, %c0_3] : memref<64x128xf32, #tpu.memory_space<vmem>>, vector<64x128xf32>
    %c0_4 = arith.constant 0 : index
    %c0_5 = arith.constant 0 : index
    %5 = vector.load %arg3[%c0_4, %c0_5] : memref<128x128xf32, #tpu.memory_space<vmem>>, vector<128x128xf32>
    %cst = arith.constant dense<0.000000e+00> : vector<64x128xf32>
    %6 = tpu.matmul %4, %5, %cst {dimension_numbers = #tpu.dot_dimension_numbers<[1], [1], [0], [0], [0, 0, 1, 0], [], []>} : vector<64x128xf32>, vector<128x128xf32>, vector<64x128xf32> -> vector<64x128xf32>
    %7 = arith.addf %3, %6 : vector<64x128xf32>
    %c0_6 = arith.constant 0 : index
    %c0_7 = arith.constant 0 : index
    %8 = vector.load %arg9[%c0_6, %c0_7] : memref<64x128xf32, #tpu.memory_space<vmem>>, vector<64x128xf32>
    tpu.vector_store %arg9[%c0_6, %c0_7], %7 {strides = array<i32>} : memref<64x128xf32, #tpu.memory_space<vmem>>, vector<64x128xf32>,
    %c1_i32 = arith.constant 1 : i32
    %9 = arith.cmpi eq, %arg1, %c1_i32 : i32
    %10 = arith.extui %9 : i1 to i32
    %c0_i32_8 = arith.constant 0 : i32
    %11 = arith.cmpi ne, %10, %c0_i32_8 : i32
    scf.if %11 {
      %c0_9 = arith.constant 0 : index
      %c0_10 = arith.constant 0 : index
      %12 = vector.load %arg9[%c0_9, %c0_10] : memref<64x128xf32, #tpu.memory_space<vmem>>, vector<64x128xf32>
      %c0_11 = arith.constant 0 : index
      %c0_12 = arith.constant 0 : index
      %13 = vector.load %arg4[%c0_11, %c0_12] : memref<1x128xf32, #tpu.memory_space<vmem>>, vector<1x128xf32>
      %14 = vector.broadcast %13 : vector<1x128xf32> to vector<64x128xf32>
      %15 = arith.addf %12, %14 : vector<64x128xf32>
      %16 = math.tanh %15 : vector<64x128xf32>
      %c0_13 = arith.constant 0 : index
      %c0_14 = arith.constant 0 : index
      %17 = vector.load %arg7[%c0_13, %c0_14] : memref<64x128xf32, #tpu.memory_space<vmem>>, vector<64x128xf32>
      tpu.vector_store %arg7[%c0_13, %c0_14], %16 {strides = array<i32>} : memref<64x128xf32, #tpu.memory_space<vmem>>, vector<64x128xf32>,
      %c0_15 = arith.constant 0 : index
      %c0_16 = arith.constant 0 : index
      %18 = vector.load %arg5[%c0_15, %c0_16] : memref<256x128xf32, #tpu.memory_space<vmem>>, vector<256x128xf32>
      %cst_17 = arith.constant dense<0.000000e+00> : vector<64x256xf32>
      %19 = tpu.matmul %16, %18, %cst_17 {dimension_numbers = #tpu.dot_dimension_numbers<[1], [1], [0], [0], [0, 0, 1, 0], [], []>} : vector<64x128xf32>, vector<256x128xf32>, vector<64x256xf32> -> vector<64x256xf32>
      %c0_18 = arith.constant 0 : index
      %c0_19 = arith.constant 0 : index
      %20 = vector.load %arg6[%c0_18, %c0_19] : memref<1x256xf32, #tpu.memory_space<vmem>>, vector<1x256xf32>
      %21 = vector.broadcast %20 : vector<1x256xf32> to vector<64x256xf32>
      %22 = arith.addf %19, %21 : vector<64x256xf32>
      %23 = math.tanh %22 : vector<64x256xf32>
      %c0_20 = arith.constant 0 : index
      %c0_21 = arith.constant 0 : index
      %24 = vector.load %arg8[%c0_20, %c0_21] : memref<64x256xf32, #tpu.memory_space<vmem>>, vector<64x256xf32>
      tpu.vector_store %arg8[%c0_20, %c0_21], %23 {strides = array<i32>} : memref<64x256xf32, #tpu.memory_space<vmem>>, vector<64x256xf32>,
    } else {
    }
    return
  }
  func.func @transform_0(%arg0: i32, %arg1: i32) -> (i32, i32) {
    %c0_i32 = arith.constant 0 : i32
    return %arg0, %arg1 : i32, i32
  }
  func.func @transform_1(%arg0: i32, %arg1: i32) -> (i32, i32) {
    %c0_i32 = arith.constant 0 : i32
    %c0_i32_0 = arith.constant 0 : i32
    return %c0_i32, %arg1 : i32, i32
  }
  func.func @transform_2(%arg0: i32, %arg1: i32) -> (i32, i32) {
    %c0_i32 = arith.constant 0 : i32
    %c0_i32_0 = arith.constant 0 : i32
    %c0_i32_1 = arith.constant 0 : i32
    return %c0_i32, %c0_i32_0 : i32, i32
  }
  func.func @transform_3(%arg0: i32, %arg1: i32) -> (i32, i32) {
    %c0_i32 = arith.constant 0 : i32
    %c0_i32_0 = arith.constant 0 : i32
    %c0_i32_1 = arith.constant 0 : i32
    return %c0_i32, %c0_i32_0 : i32, i32
  }
  func.func @transform_4(%arg0: i32, %arg1: i32) -> (i32, i32) {
    %c0_i32 = arith.constant 0 : i32
    %c0_i32_0 = arith.constant 0 : i32
    %c0_i32_1 = arith.constant 0 : i32
    return %c0_i32, %c0_i32_0 : i32, i32
  }
  func.func @transform_5(%arg0: i32, %arg1: i32) -> (i32, i32) {
    %c0_i32 = arith.constant 0 : i32
    %c0_i32_0 = arith.constant 0 : i32
    return %arg0, %c0_i32 : i32, i32
  }
  func.func @transform_6(%arg0: i32, %arg1: i32) -> (i32, i32) {
    %c0_i32 = arith.constant 0 : i32
    %c0_i32_0 = arith.constant 0 : i32
    return %arg0, %c0_i32 : i32, i32
  }
}

</mosaic_0001>

<bundles_post_ra>
// kernel: tpu_custom_call.1
= control target key start
LH: loop header
LB: loop body
LE: loop exit
PB: predicated region body
PF: predicated region fallthrough
CT: control target
= control target key end

     0   :  { %s1869_s0 = inlined_call_operand.hbm [shape: f32[128,256], index: 0, kind: input, shape index: {}]   ;;  %s1870_s1 = inlined_call_operand.hbm [shape: f32[128,256], index: 1, kind: input, shape index: {}]   ;;  %s1871_s2 = inlined_call_operand.vmem [shape: f32[1,128], index: 2, kind: input, shape index: {}]   ;;  %s1872_s3 = inlined_call_operand.hbm [shape: f32[256,128], index: 3, kind: input, shape index: {}]   ;;  %s1873_s4 = inlined_call_operand.vmem [shape: f32[1,256], index: 4, kind: input, shape index: {}]   ;;  %s1874_s5 = inlined_call_operand.hbm [shape: f32[128,128], index: 5, kind: output, shape index: {0}]   ;;  %s1875_s6 = inlined_call_operand.hbm [shape: f32[128,256], index: 6, kind: output, shape index: {1}]  }
   0x1   :  { %1892 = sst [smem:[#allocation28_spill]] %s1869_s0 }
   0x2   :  { %1893 = sst [smem:[#allocation29_spill]] %s1871_s2 }
   0x3   :  { %1894 = sst [smem:[#allocation30_spill]] %s1872_s3 }
   0x4   :  { %1895 = sst [smem:[#allocation31_spill]] %s1873_s4 }
   0x5   :  { %1896 = sst [smem:[#allocation32_spill]] %s1874_s5 }
   0x6   :  { %1897 = sst [smem:[#allocation33_spill]] %s1875_s6 }
   0x7   :  { %12 = vsyncpa [#allocation4], 0 }
   0x8   :  { %14 = vsyncpa [#allocation4 + $0x1], 0 }
   0x9   :  { %15 = vsyncpa [#allocation7], 0 }
   0xa   :  { %17 = vsyncpa [#allocation7 + $0x1], 0 }
   0xb   :  { %18 = vsyncpa [#allocation5], 0 }
   0xc   :  { %20 = vsyncpa [#allocation5 + $0x1], 0 }
   0xd   :  { %21 = vsyncpa [#allocation11], 0 }
   0xe   :  { %23 = vsyncpa [#allocation11 + $0x1], 0  ;;  %s1480_s21 = smov 0   ;;  %s1482_s22 = smov 0  }
   0xf   :  { %s1484_s23 = smov 0   ;;  %s1486_s24 = smov 0  }
  0x10   :  { %s1488_s25 = smov 0   ;;  %s1490_s26 = smov 0  }
  0x11   :  { %s1492_s27 = smov 0   ;;  %s1494_s28 = smov 0  }
  0x12   :  { %s1496_s29 = smov 0   ;;  %s1498_s30 = smov 0  }
  0x13   :  { %s1500_s7 = smov 0   ;;  %s1502_s8 = smov 0  }
  0x14   :  { %s1504_s9 = smov 0   ;;  %s1506_s10 = smov 0  }
  0x15 LB: > { %1898 = sst [smem:[#allocation17_spill]] %s1382_s21  ;;  %s1547_s11 = sadd.s32 4294967295, %s1434_s10   ;;  %s1434_s10 = sphi %s1506_s10, %s29_s10   ;;  %s1430_s9 = sphi %s1504_s9, %s1935_s9   ;;  %s1426_s8 = sphi %s1502_s8, %s1944_s8   ;;  %s1422_s7 = sphi %s1500_s7, %s1933_s7   ;;  %s1418_s30 = sphi %s1498_s30, %s1943_s30   ;;  %s1414_s29 = sphi %s1496_s29, %s1932_s29   ;;  %s1410_s28 = sphi %s1494_s28, %s1942_s28   ;;  %s1406_s27 = sphi %s1492_s27, %s1941_s27   ;;  %s1402_s26 = sphi %s1490_s26, %s1940_s26   ;;  %s1398_s25 = sphi %s1488_s25, %s1939_s25   ;;  %s1394_s24 = sphi %s1486_s24, %s1938_s24   ;;  %s1390_s23 = sphi %s1484_s23, %s1930_s23   ;;  %s1386_s22 = sphi %s1482_s22, %s1937_s22   ;;  %s1382_s21 = sphi %s1480_s21, %s1936_s21  }
  0x16   : > { %1899 = sst [smem:[#allocation18_spill]] %s1390_s23  ;;  %s843_s12 = sadd.s32 4294967294, %s1434_s10  }
  0x17   : > { %1900 = sst [smem:[#allocation19_spill]] %s1414_s29  ;;  %p63_p0 = scmp.ne.s32.totalorder %s1410_s28, %s1406_s27 }
  0x18   : > { %1901 = sst [smem:[#allocation20_spill]] %s1422_s7  ;;  %p64_p1 = scmp.eq.s32.totalorder %s1547_s11, 0 }
  0x19   : > { %1902 = sst [smem:[#allocation21_spill]] %s1430_s9  ;;  %p89_p2 = scmp.ne.s32.totalorder %s1398_s25, %s1394_s24 }
  0x1a   : > { %p175_p3 = scmp.ne.s32.totalorder %s1390_s23, %s1386_s22  ;;  %p1557_p4 = por %p64_p1, %p63_p0 }
  0x1b   : > { %p176_p5 = scmp.eq.s32.totalorder %s1547_s11, 3  ;;  %p1564_p6 = por %p89_p2, %p64_p1 }
  0x1c   : > { %p181_p7 = scmp.ne.s32.totalorder %s1386_s22, %s1382_s21  ;;  %p182_p9 = scmp.eq.s32.totalorder %s843_s12, 3 }
  0x1d   : > { %p1570_p8 = por %p176_p5, %p175_p3  ;;  %p844_p10 = scmp.ge.s32.totalorder %s1434_s10, 1 }
  0x1e   : > { %p215_p11 = scmp.lt.s32.totalorder %s1434_s10, 5  ;;  %p1576_p12 = por %p182_p9, %p181_p7 }
  0x1f   : > { %s1905_s15 = scalar_select %p1570_p8, 1, 0 }
  0x20   : > { %s1907_s16 = scalar_select %p1576_p12, 1, 0 }
  0x21   : > { %1906 = sst [smem:[#allocation22_spill]] %s1905_s15  ;;  %p1580_p13 = pnand %p844_p10, %p215_p11 }
  0x22   : > { %1908 = sst [smem:[#allocation23_spill]] %s1907_s16  ;;  %s1436_s24 = smov [#allocation8]  }
  0x23   : > { %s1910_s3 = sld [smem:[#allocation30_spill]]  ;;  %p966_p0 = pneg %p1580_p13 }
  0x24   : > { %s231_s27 = sshll.u32 %s1436_s24, 4  ;;  %s1877_s12 = smov 128   ;;  %s232_s27 = int_to_ptr.vmem [resolvable:$true] %s231_s27 }
  0x25   : > { %p967_p2 = pnand %p966_p0, %p64_p1  ;;  %s1879_s16 = smov 8  }
  0x26   : > { %s38_s18 = sadd.s32 1, %s1426_s8  ;;  %s41_s19 = sadd.s32 1, %s1430_s9 }
  0x27   : > { %p39_p3 = scmp.ge.s32.totalorder %s38_s18, 2  ;;  %p57_p5 = scmp.ne.s32.totalorder %s1414_s29, %s1410_s28 }
  0x28   : > { %p58_p7 = scmp.eq.s32.totalorder %s1434_s10, 0  ;;  %p985_p0 = scmp.lt.s32.totalorder %s1434_s10, 4 }
  0x29   : > { %s229_s20 = sshll.u32 %s1910_s3, 4  ;;  %s50_s3 = sadd.s32 1, %s1414_s29  ;;  %s230_s20 = int_to_ptr.hbm [resolvable:$true] %s229_s20 }
  0x2a   : > { %969 = dma.hbm_to_vmem [thread:$0]  (!%p967_p2), %s230_s20, 4096, %s232_s27, [#allocation7], %s1877_s12, %s1877_s12, %s1879_s16  }
  0x2b   : > { %s1946_s18 = smov (%p39_p3, %s38_s18), 0  ;;  %s1948_s19 = smov (!%p39_p3, %s41_s19), %s1430_s9 }
  0x2c   : > { %1911 = sst [smem:[#allocation24_spill]] %s1946_s18  ;;  %s1605_s24 = ssub.s32 %s1426_s8, %s1946_s18 }
  0x2d   : > { %p1609_p9 = por %p58_p7, %p57_p5  ;;  %p43_p10 = scmp.ge.s32.totalorder %s1948_s19, 2 }
  0x2e   : > { %p74_p11 = scmp.eq.s32.totalorder %s1605_s24, 0  ;;  %s165_s27 = sadd.s32 1, %s1390_s23 }
  0x2f   : > { %s1950_s19 = smov (%p43_p10, %s1948_s19), 0  ;;  %s248_s12 = sand.u32 1, %s1414_s29  }
  0x30   : > { %1913 = sst [smem:[#allocation25_spill]] %s1950_s19  ;;  %s870_s16 = sshll.u32 %s1430_s9, 4 }
  0x31   : > { %s45_s18 = ssub.s32 %s1430_s9, %s1950_s19  ;;  %s847_s6 = sshll.u32 %s248_s12, 6 }
  0x32   : > { %s47_s21 = sor.u32 %s1605_s24, %s45_s18  ;;  %p163_p2 = scmp.eq.s32.totalorder %s45_s18, 0 }
  0x33   : > { %p48_p3 = scmp.eq.s32.totalorder %s47_s21, 0  ;;  %s257_s7 = sadd.s32 %s1426_s8, %s870_s16 }
  0x34   : > { %s1624_s5 = scalar_select %p163_p2, %s1390_s23, %s165_s27  }
  0x35   : > { %s1627_s15 = scalar_select %p48_p3, %s1414_s29, %s50_s3  }
  0x36   : > { %1914 = sst [smem:[#allocation26_spill]] %s1624_s5  ;;  %s850_s4 = sshll.u32 %s257_s7, 3 }
  0x37   : > { %1915 = sst [smem:[#allocation27_spill]] %s1627_s15  ;;  %s252_s2 = scalar_lea.vmem [#allocation3], %s847_s6 }
  0x38   : > { %s262_s19 = sshll.u32 %s252_s2, 4  ;;  %s1916_s0 = sld [smem:[#allocation28_spill]]  ;;  %s263_s19 = int_to_ptr.vmem [resolvable:$true] %s262_s19 }
  0x39   : > { %p971_p5 = pnand %p985_p0, %p1609_p9  ;;  %s249_s3 = scalar_lea.sflag [#allocation4], %s248_s12 }
  0x3a   : > { %s1439_s15 = smov 256   ;;  %s1917_s29 = smov 8  }
  0x3b   : > { %s1918_s16 = smov 128   ;;  %s272_s7 = sand.u32 1, %s1434_s10  }
  0x3c   : > { %s76_s6 = sadd.s32 1, %s1402_s26  ;;  %p83_p10 = scmp.ne.s32.totalorder %s1402_s26, %s1398_s25 }
  0x3d   : > { %s1646_s2 = scalar_select %p74_p11, %s1402_s26, %s76_s6  }
  0x3e   : > { %s259_s9 = scalar_lea.hbm %s1916_s0, %s850_s4  ;;  %p85_p2 = por %p83_p10, %p58_p7 }
  0x3f   : > { %s260_s27 = sshll.u32 %s259_s9, 4  ;;  %s274_s4 = sand.u32 1, %s1402_s26   ;;  %s261_s27 = int_to_ptr.hbm [resolvable:$true] %s260_s27 }
  0x40   : > { %973 = dma.hbm_to_vmem [thread:$0]  (!%p971_p5), %s261_s27, 1024, %s263_s19, %s249_s3, %s1439_s15, %s1918_s16, %s1917_s29  }
  0x41   : > { %s852_s9 = sshll.u32 %s1426_s8, 3  ;;  %s851_s20 = sshll.u32 %s274_s4, 7 }
  0x42   : > { %s280_s12 = scalar_lea.hbm %s1870_s1, %s852_s9  ;;  %s276_s5 = scalar_lea.vmem [#allocation6], %s851_s20 }
  0x43   : > { %s281_s0 = sshll.u32 %s280_s12, 4  ;;  %s283_s23 = sshll.u32 %s276_s5, 4  ;;  %s282_s0 = int_to_ptr.hbm [resolvable:$true] %s281_s0  ;;  %s284_s23 = int_to_ptr.vmem [resolvable:$true] %s283_s23 }
  0x44   : > { %p974_p9 = pnand %p985_p0, %p85_p2  ;;  %s273_s19 = scalar_lea.sflag [#allocation7], %s272_s7 }
  0x45   : > { %295 = sbr.rel (%p1580_p13) target bundleno = 581 (0x245), region = 40  ;;  %s297_s24 = sand.u32 (!%p1580_p13), 1, %s1410_s28  }
  0x46   : > { %976 = dma.hbm_to_vmem [thread:$0]  (!%p974_p9), %s282_s0, 2048, %s284_s23, %s273_s19, %s1439_s15, %s1918_s16, %s1917_s29  }
  0x47   : > { %s854_s27 = sshll.u32 (!%p1580_p13), %s297_s24, 6  ;;  %s298_s3 = scalar_lea.sflag (!%p1580_p13), [#allocation4], %s297_s24 }
  0x48   : > { %s1662_s6 = scalar_lea.vmem (!%p1580_p13), [#allocation3], %s854_s27 }
  0x4a   : > { %1361 = dma.done.wait (%p1557_p4), %s298_s3, 1024  }
  0x4b   : > { %1363 = vsyncadd (%p1557_p4), %s298_s3, 4294966272  ;;  %s307_s5 = sand.u32 1, %s1547_s11   ;;  %s309_s0 = sand.u32 1, %s1398_s25  }
  0x4c   : > { %s855_s23 = sshll.u32 %s309_s0, 7  ;;  %s308_s29 = scalar_lea.sflag [#allocation7], %s307_s5 }
  0x4d   : > { %s1670_s15 = scalar_lea.vmem [#allocation6], %s855_s23 }
  0x4e   : > { %1365 = dma.done.wait (%p1564_p6), %s308_s29, 2048  }
  0x4f   : > { %1367 = vsyncadd (%p1564_p6), %s308_s29, 4294965248 }
  0x50   : > { %1369 = dma.done.wait (%p64_p1), [#allocation7], 4096  }
  0x51   : > { %1371 = vsyncadd (%p64_p1), [#allocation7], 4294963200  ;;  %s1681_s13 = sand.u32 1, %s1386_s22   ;;  %p859_p4 = scmp.ne.s32.totalorder %s1418_s30, 0 }
  0x52   : > { %s857_s17 = sshll.u32 %s1681_s13, 6  ;;  %s858_s16 = sshll.u32 %s1681_s13, 7 }
  0x53   : > { %s1685_s7 = scalar_lea.vmem [#allocation9], %s857_s17  ;;  %s1687_s4 = scalar_lea.vmem [#allocation10], %s858_s16 }
  0x54   : > { %362 = sbr.rel (%p859_p4) target bundleno = 98 (0x62), region = 56 }
  0x59   : > { %v1440_v0 = vmov 0.0  }
  0x5a   : > { %363 = vst [vmem:[#allocation2 + $0x30] sm:$0xff] %v1440_v0 }
  0x5b   : > { %364 = vst [vmem:[#allocation2] sm:$0xff] %v1440_v0 }
  0x5c   : > { %365 = vst [vmem:[#allocation2 + $0x18] sm:$0xff] %v1440_v0 }
  0x5d   : > { %366 = vst [vmem:[#allocation2 + $0x10] sm:$0xff] %v1440_v0 }
  0x5e   : > { %367 = vst [vmem:[#allocation2 + $0x8] sm:$0xff] %v1440_v0 }
  0x5f   : > { %368 = vst [vmem:[#allocation2 + $0x20] sm:$0xff] %v1440_v0 }
  0x60   : > { %369 = vst [vmem:[#allocation2 + $0x28] sm:$0xff] %v1440_v0 }
  0x61   : > { %370 = vst [vmem:[#allocation2 + $0x38] sm:$0xff] %v1440_v0 }
  0x62 PF: > { %v402_v1 = vld [vmem:[%s1670_s15 + $0x78] sm:$0xff]  ;;  %v401_v2 = vld [vmem:[%s1670_s15 + $0x70] sm:$0xff]  ;;  %v400_v3 = vld [vmem:[%s1670_s15 + $0x68] sm:$0xff]  ;;  %p860_p1 = scmp.ne.s32.totalorder %s1418_s30, 1 }
  0x63   : > { %875 = vmatpush.xpose.msra.mxu2 %v402_v1  ;;  %876 = vmatpush.xpose.msra.mxu3 %v402_v1  ;;  %v399_v4 = vld [vmem:[%s1670_s15 + $0x60] sm:$0xff]  ;;  %v398_v5 = vld [vmem:[%s1670_s15 + $0x58] sm:$0xff]  ;;  %v397_v6 = vld [vmem:[%s1670_s15 + $0x50] sm:$0xff]  ;;  %s1919_s14 = sld [smem:[#allocation29_spill]] (!%p860_p1) }
  0x64   : > { %403 = vmatpush.xpose.msra.mxu0 %v402_v1  ;;  %874 = vmatpush.xpose.msra.mxu1 %v402_v1  ;;  %v396_v7 = vld [vmem:[%s1670_s15 + $0x48] sm:$0xff]  ;;  %v395_v8 = vld [vmem:[%s1670_s15 + $0x40] sm:$0xff]  ;;  %v394_v9 = vld [vmem:[%s1670_s15 + $0x38] sm:$0xff]  ;;  %s1920_s18 = sld [smem:[#allocation31_spill]] (!%p860_p1) }
  0x65   : > { %v393_v10 = vld [vmem:[%s1670_s15 + $0x30] sm:$0xff]  ;;  %v392_v11 = vld [vmem:[%s1670_s15 + $0x28] sm:$0xff]  ;;  %v391_v12 = vld [vmem:[%s1670_s15 + $0x20] sm:$0xff] }
  0x66   : > { %v390_v13 = vld [vmem:[%s1670_s15 + $0x18] sm:$0xff]  ;;  %v389_v14 = vld [vmem:[%s1670_s15 + $0x10] sm:$0xff]  ;;  %v388_v15 = vld [vmem:[%s1670_s15 + $0x8] sm:$0xff] }
  0x67   : > { %878 = vmatpush.xpose.msra.mxu2 %v401_v2  ;;  %879 = vmatpush.xpose.msra.mxu3 %v401_v2  ;;  %v387_v16 = vld [vmem:[%s1670_s15] sm:$0xff]  ;;  %v385_v18 = vld [vmem:[%s1662_s6 + $0x30] sm:$0xff]  ;;  %v384_v21 = vld [vmem:[%s1662_s6 + $0x28] sm:$0xff] }
  0x68   : > { %404 = vmatpush.xpose.msra.mxu0 %v401_v2  ;;  %877 = vmatpush.xpose.msra.mxu1 %v401_v2  ;;  %v383_v17 = vld [vmem:[%s1662_s6 + $0x20] sm:$0xff]  ;;  %v381_v20 = vld [vmem:[%s1662_s6 + $0x10] sm:$0xff]  ;;  %v386_v22 = vld [vmem:[%s1662_s6 + $0x38] sm:$0xff] }
  0x69   : > { %v379_v19 = vld [vmem:[%s1662_s6] sm:$0xff]  ;;  %v380_v23 = vld [vmem:[%s1662_s6 + $0x8] sm:$0xff]  ;;  %v382_v24 = vld [vmem:[%s1662_s6 + $0x18] sm:$0xff] }
  0x6a   : > { %v371_v25 = vld [vmem:[#allocation2 + $0x30] sm:$0xff]  ;;  %v373_v26 = vld [vmem:[#allocation2 + $0x18] sm:$0xff]  ;;  %v375_v31 = vld [vmem:[#allocation2 + $0x8] sm:$0xff] }
  0x6b   : > { %881 = vmatpush.xpose.msra.mxu2 %v400_v3  ;;  %882 = vmatpush.xpose.msra.mxu3 %v400_v3  ;;  %v377_v32 = vld [vmem:[#allocation2 + $0x28] sm:$0xff]  ;;  %v372_v37 = vld [vmem:[#allocation2] sm:$0xff]  ;;  %v374_v38 = vld [vmem:[#allocation2 + $0x10] sm:$0xff] }
  0x6c   : > { %405 = vmatpush.xpose.msra.mxu0 %v400_v3  ;;  %880 = vmatpush.xpose.msra.mxu1 %v400_v3  ;;  %v376_v43 = vld [vmem:[#allocation2 + $0x20] sm:$0xff]  ;;  %v378_v44 = vld [vmem:[#allocation2 + $0x38] sm:$0xff] }
  0x6f   : > { %884 = vmatpush.xpose.msra.mxu2 %v399_v4  ;;  %885 = vmatpush.xpose.msra.mxu3 %v399_v4 }
  0x70   : > { %406 = vmatpush.xpose.msra.mxu0 %v399_v4  ;;  %883 = vmatpush.xpose.msra.mxu1 %v399_v4 }
  0x73   : > { %887 = vmatpush.xpose.msra.mxu2 %v398_v5  ;;  %888 = vmatpush.xpose.msra.mxu3 %v398_v5 }
  0x74   : > { %407 = vmatpush.xpose.msra.mxu0 %v398_v5  ;;  %886 = vmatpush.xpose.msra.mxu1 %v398_v5 }
  0x77   : > { %890 = vmatpush.xpose.msra.mxu2 %v397_v6  ;;  %891 = vmatpush.xpose.msra.mxu3 %v397_v6 }
  0x78   : > { %408 = vmatpush.xpose.msra.mxu0 %v397_v6  ;;  %889 = vmatpush.xpose.msra.mxu1 %v397_v6 }
  0x7b   : > { %893 = vmatpush.xpose.msra.mxu2 %v396_v7  ;;  %894 = vmatpush.xpose.msra.mxu3 %v396_v7 }
  0x7c   : > { %409 = vmatpush.xpose.msra.mxu0 %v396_v7  ;;  %892 = vmatpush.xpose.msra.mxu1 %v396_v7 }
  0x7f   : > { %896 = vmatpush.xpose.msra.mxu2 %v395_v8  ;;  %897 = vmatpush.xpose.msra.mxu3 %v395_v8 }
  0x80   : > { %410 = vmatpush.xpose.msra.mxu0 %v395_v8  ;;  %895 = vmatpush.xpose.msra.mxu1 %v395_v8 }
  0x83   : > { %899 = vmatpush.xpose.msra.mxu2 %v394_v9  ;;  %900 = vmatpush.xpose.msra.mxu3 %v394_v9 }
  0x84   : > { %411 = vmatpush.xpose.msra.mxu0 %v394_v9  ;;  %898 = vmatpush.xpose.msra.mxu1 %v394_v9 }
  0x87   : > { %902 = vmatpush.xpose.msra.mxu2 %v393_v10  ;;  %903 = vmatpush.xpose.msra.mxu3 %v393_v10 }
  0x88   : > { %412 = vmatpush.xpose.msra.mxu0 %v393_v10  ;;  %901 = vmatpush.xpose.msra.mxu1 %v393_v10 }
  0x8b   : > { %905 = vmatpush.xpose.msra.mxu2 %v392_v11  ;;  %906 = vmatpush.xpose.msra.mxu3 %v392_v11 }
  0x8c   : > { %413 = vmatpush.xpose.msra.mxu0 %v392_v11  ;;  %904 = vmatpush.xpose.msra.mxu1 %v392_v11 }
  0x8f   : > { %908 = vmatpush.xpose.msra.mxu2 %v391_v12  ;;  %909 = vmatpush.xpose.msra.mxu3 %v391_v12 }
  0x90   : > { %414 = vmatpush.xpose.msra.mxu0 %v391_v12  ;;  %907 = vmatpush.xpose.msra.mxu1 %v391_v12 }
  0x93   : > { %911 = vmatpush.xpose.msra.mxu2 %v390_v13  ;;  %912 = vmatpush.xpose.msra.mxu3 %v390_v13 }
  0x94   : > { %415 = vmatpush.xpose.msra.mxu0 %v390_v13  ;;  %910 = vmatpush.xpose.msra.mxu1 %v390_v13 }
  0x97   : > { %914 = vmatpush.xpose.msra.mxu2 %v389_v14  ;;  %915 = vmatpush.xpose.msra.mxu3 %v389_v14 }
  0x98   : > { %416 = vmatpush.xpose.msra.mxu0 %v389_v14  ;;  %913 = vmatpush.xpose.msra.mxu1 %v389_v14 }
  0x9b   : > { %917 = vmatpush.xpose.msra.mxu2 %v388_v15  ;;  %918 = vmatpush.xpose.msra.mxu3 %v388_v15 }
  0x9c   : > { %417 = vmatpush.xpose.msra.mxu0 %v388_v15  ;;  %916 = vmatpush.xpose.msra.mxu1 %v388_v15 }
  0x9f   : > { %920 = vmatpush.xpose.msra.mxu2 %v387_v16  ;;  %921 = vmatpush.xpose.msra.mxu3 %v387_v16 }
  0xa0   : > { %418 = vmatpush.xpose.msra.mxu0 %v387_v16  ;;  %919 = vmatpush.xpose.msra.mxu1 %v387_v16 }
  0xa2   : > { %431 = vmatmul.f32.vlgmr.msra.gmra.mxu2 %v383_v17  ;;  %437 = vmatmul.f32.vlgmr.msra.gmra.mxu3 %v385_v18 }
  0xa3   : > { %419 = vmatmul.f32.vlgmr.msra.gmra.mxu0 %v379_v19  ;;  %425 = vmatmul.f32.vlgmr.msra.gmra.mxu1 %v381_v20 }
  0xaa   : > { %434 = vmatmul.f32.gmra.mxu2 %v384_v21  ;;  %440 = vmatmul.f32.gmra.mxu3 %v386_v22 }
  0xab   : > { %422 = vmatmul.f32.gmra.mxu0 %v380_v23  ;;  %428 = vmatmul.f32.gmra.mxu1 %v382_v24 }
 0x120   : > { %v420_v27 = vpop.f32.mrf.mxu0  ;;  %v426_v28 = vpop.f32.mrf.mxu1 }
 0x121   : > { %v444_v29 = vadd.f32 %v420_v27, %v371_v25  ;;  %v446_v30 = vadd.f32 %v426_v28, %v373_v26 }
 0x123   : > { %452 = vst [vmem:[#allocation2 + $0x30] sm:$0xff] %v444_v29 }
 0x124   : > { %454 = vst [vmem:[#allocation2 + $0x18] sm:$0xff] %v446_v30 }
 0x125   : > { %v432_v33 = vpop.f32.mrf.mxu2  ;;  %v438_v34 = vpop.f32.mrf.mxu3 }
 0x126   : > { %v448_v35 = vadd.f32 %v432_v33, %v375_v31  ;;  %v450_v36 = vadd.f32 %v438_v34, %v377_v32 }
 0x128   : > { %456 = vst [vmem:[#allocation2 + $0x8] sm:$0xff] %v448_v35  ;;  %v423_v39 = vpop.f32.mrf.mxu0  ;;  %v429_v40 = vpop.f32.mrf.mxu1 }
 0x129   : > { %458 = vst [vmem:[#allocation2 + $0x28] sm:$0xff] %v450_v36  ;;  %v445_v41 = vadd.f32 %v423_v39, %v372_v37  ;;  %v447_v42 = vadd.f32 %v429_v40, %v374_v38 }
 0x12b   : > { %453 = vst [vmem:[#allocation2] sm:$0xff] %v445_v41 }
 0x12c   : > { %455 = vst [vmem:[#allocation2 + $0x10] sm:$0xff] %v447_v42 }
 0x12d   : > { %v435_v45 = vpop.f32.mrf.mxu2  ;;  %v441_v46 = vpop.f32.mrf.mxu3  ;;  %463 = sbr.rel (%p860_p1) target bundleno = 537 (0x219), region = 60 }
 0x12e   : > { %v449_v47 = vadd.f32 %v435_v45, %v376_v43  ;;  %v451_v48 = vadd.f32 %v441_v46, %v378_v44 }
 0x130   : > { %457 = vst [vmem:[#allocation2 + $0x20] sm:$0xff] %v449_v47 }
 0x131   : > { %459 = vst [vmem:[#allocation2 + $0x38] sm:$0xff] %v451_v48 }
 0x132   : > { %v515_v49 = vld [vmem:[#allocation8 + $0x78] sm:$0xff]  ;;  %v514_v51 = vld [vmem:[#allocation8 + $0x70] sm:$0xff]  ;;  %v513_v53 = vld [vmem:[#allocation8 + $0x68] sm:$0xff] }
 0x133   : > { %v531_v50 = vld [vmem:[#allocation8 + $0xf8] sm:$0xff]  ;;  %922 = vmatpush.xpose.msra.mxu2 %v515_v49  ;;  %v530_v52 = vld [vmem:[#allocation8 + $0xf0] sm:$0xff]  ;;  %538 = vmatpush.xpose.msra.mxu0 %v515_v49  ;;  %v529_v54 = vld [vmem:[#allocation8 + $0xe8] sm:$0xff] }
 0x134   : > { %938 = vmatpush.xpose.msra.mxu3 %v531_v50  ;;  %579 = vmatpush.xpose.msra.mxu1 %v531_v50  ;;  %v512_v55 = vld [vmem:[#allocation8 + $0x60] sm:$0xff]  ;;  %v511_v57 = vld [vmem:[#allocation8 + $0x58] sm:$0xff]  ;;  %v510_v59 = vld [vmem:[#allocation8 + $0x50] sm:$0xff] }
 0x135   : > { %v528_v56 = vld [vmem:[#allocation8 + $0xe0] sm:$0xff]  ;;  %v527_v58 = vld [vmem:[#allocation8 + $0xd8] sm:$0xff]  ;;  %v526_v60 = vld [vmem:[#allocation8 + $0xd0] sm:$0xff] }
 0x136   : > { %v1718_v61 = vld [vmem:[%s1919_s14] ss:$0 sm:$0xff]  ;;  %v509_v62 = vld [vmem:[#allocation8 + $0x48] sm:$0xff]  ;;  %v464_v4 = vld [vmem:[#allocation2 + $0x30] sm:$0xff] }
 0x137   : > { %923 = vmatpush.xpose.msra.mxu2 %v514_v51  ;;  %539 = vmatpush.xpose.msra.mxu0 %v514_v51  ;;  %v525_v63 = vld [vmem:[#allocation8 + $0xc8] sm:$0xff]  ;;  %v508_v2 = vld [vmem:[#allocation8 + $0x40] sm:$0xff]  ;;  %v476_v5 = vadd.f32 %v1718_v61, %v464_v4  ;;  %v507_v6 = vld [vmem:[#allocation8 + $0x38] sm:$0xff] }
 0x138   : > { %939 = vmatpush.xpose.msra.mxu3 %v530_v52  ;;  %580 = vmatpush.xpose.msra.mxu1 %v530_v52  ;;  %v468_v0 = vld [vmem:[#allocation2 + $0x8] sm:$0xff]  ;;  %v524_v3 = vld [vmem:[#allocation8 + $0xc0] sm:$0xff]  ;;  %v523_v7 = vld [vmem:[#allocation8 + $0xb8] sm:$0xff] }
 0x139   : > { %v480_v1 = vadd.f32 %v1718_v61, %v468_v0  ;;  %v469_v8 = vld [vmem:[#allocation2 + $0x20] sm:$0xff]  ;;  %v506_v11 = vld [vmem:[#allocation8 + $0x30] sm:$0xff]  ;;  %v505_v16 = vld [vmem:[#allocation8 + $0x28] sm:$0xff] }
 0x13a   : > { %v481_v10 = vadd.f32 %v1718_v61, %v469_v8  ;;  %v522_v12 = vld [vmem:[#allocation8 + $0xb0] sm:$0xff]  ;;  %v465_v13 = vld [vmem:[#allocation2] sm:$0xff]  ;;  %v521_v17 = vld [vmem:[#allocation8 + $0xa8] sm:$0xff] }
 0x13b   : > { %924 = vmatpush.xpose.msra.mxu2 %v513_v53  ;;  %540 = vmatpush.xpose.msra.mxu0 %v513_v53  ;;  %1110 = vtanh.f32 %v480_v1  ;;  %v477_v15 = vadd.f32 %v1718_v61, %v465_v13  ;;  %v470_v18 = vld [vmem:[#allocation2 + $0x28] sm:$0xff]  ;;  %v504_v21 = vld [vmem:[#allocation8 + $0x20] sm:$0xff]  ;;  %v466_v23 = vld [vmem:[#allocation2 + $0x18] sm:$0xff] }
 0x13c   : > { %940 = vmatpush.xpose.msra.mxu3 %v529_v54  ;;  %581 = vmatpush.xpose.msra.mxu1 %v529_v54  ;;  %1112 = vtanh.f32 %v476_v5  ;;  %v482_v20 = vadd.f32 %v1718_v61, %v470_v18  ;;  %v520_v22 = vld [vmem:[#allocation8 + $0xa0] sm:$0xff]  ;;  %v478_v25 = vadd.f32 %v1718_v61, %v466_v23  ;;  %v503_v26 = vld [vmem:[#allocation8 + $0x18] sm:$0xff]  ;;  %v502_v31 = vld [vmem:[#allocation8 + $0x10] sm:$0xff] }
 0x13d   : > { %1114 = vtanh.f32 %v481_v10  ;;  %v519_v27 = vld [vmem:[#allocation8 + $0x98] sm:$0xff]  ;;  %v518_v32 = vld [vmem:[#allocation8 + $0x90] sm:$0xff]  ;;  %v501_v36 = vld [vmem:[#allocation8 + $0x8] sm:$0xff] }
 0x13e   : > { %1116 = vtanh.f32 %v477_v15  ;;  %v471_v28 = vld [vmem:[#allocation2 + $0x38] sm:$0xff]  ;;  %v467_v33 = vld [vmem:[#allocation2 + $0x10] sm:$0xff]  ;;  %v517_v37 = vld [vmem:[#allocation8 + $0x88] sm:$0xff] }
 0x13f   : > { %925 = vmatpush.xpose.msra.mxu2 %v512_v55  ;;  %541 = vmatpush.xpose.msra.mxu0 %v512_v55  ;;  %1118 = vtanh.f32 %v482_v20  ;;  %v483_v30 = vadd.f32 %v1718_v61, %v471_v28  ;;  %v479_v35 = vadd.f32 %v1718_v61, %v467_v33  ;;  %v500_v39 = vld [vmem:[#allocation8] sm:$0xff] }
 0x140   : > { %941 = vmatpush.xpose.msra.mxu3 %v528_v56  ;;  %582 = vmatpush.xpose.msra.mxu1 %v528_v56  ;;  %1120 = vtanh.f32 %v478_v25  ;;  %v516_v40 = vld [vmem:[#allocation8 + $0x80] sm:$0xff] }
 0x141   : > { %v1722_v9 = vpop.eup %1110  ;;  %1122 = vtanh.f32 %v483_v30  ;;  %v532_v42 = vld [vmem:[%s1920_s18] sm:$0x3] }
 0x142   : > { %496 = vst [vmem:[%s1685_s7 + $0x20] sm:$0xff] %v1722_v9  ;;  %v1727_v14 = vpop.eup %1112  ;;  %1124 = vtanh.f32 %v479_v35  ;;  %v1749_v43 = vperm.slane %v532_v42, 0  ;;  %v1751_v44 = vperm.slane %v532_v42, 1 }
 0x143   : > { %926 = vmatpush.xpose.msra.mxu2 %v511_v57  ;;  %542 = vmatpush.xpose.msra.mxu0 %v511_v57  ;;  %492 = vst [vmem:[%s1685_s7] sm:$0xff] %v1727_v14  ;;  %v1115_v19 = vpop.eup %1114 }
 0x144   : > { %942 = vmatpush.xpose.msra.mxu3 %v527_v58  ;;  %583 = vmatpush.xpose.msra.mxu1 %v527_v58  ;;  %497 = vst [vmem:[%s1685_s7 + $0x28] sm:$0xff] %v1115_v19  ;;  %v1117_v24 = vpop.eup %1116 }
 0x145   : > { %493 = vst [vmem:[%s1685_s7 + $0x8] sm:$0xff] %v1117_v24  ;;  %v1119_v29 = vpop.eup %1118 }
 0x146   : > { %498 = vst [vmem:[%s1685_s7 + $0x30] sm:$0xff] %v1119_v29  ;;  %v1121_v34 = vpop.eup %1120 }
 0x147   : > { %927 = vmatpush.xpose.msra.mxu2 %v510_v59  ;;  %543 = vmatpush.xpose.msra.mxu0 %v510_v59  ;;  %494 = vst [vmem:[%s1685_s7 + $0x10] sm:$0xff] %v1121_v34  ;;  %v1123_v38 = vpop.eup %1122 }
 0x148   : > { %943 = vmatpush.xpose.msra.mxu3 %v526_v60  ;;  %584 = vmatpush.xpose.msra.mxu1 %v526_v60  ;;  %499 = vst [vmem:[%s1685_s7 + $0x38] sm:$0xff] %v1123_v38  ;;  %v1125_v41 = vpop.eup %1124 }
 0x149   : > { %495 = vst [vmem:[%s1685_s7 + $0x18] sm:$0xff] %v1125_v41 }
 0x14b   : > { %928 = vmatpush.xpose.msra.mxu2 %v509_v62  ;;  %544 = vmatpush.xpose.msra.mxu0 %v509_v62 }
 0x14c   : > { %944 = vmatpush.xpose.msra.mxu3 %v525_v63  ;;  %585 = vmatpush.xpose.msra.mxu1 %v525_v63 }
 0x14f   : > { %929 = vmatpush.xpose.msra.mxu2 %v508_v2  ;;  %545 = vmatpush.xpose.msra.mxu0 %v508_v2 }
 0x150   : > { %945 = vmatpush.xpose.msra.mxu3 %v524_v3  ;;  %586 = vmatpush.xpose.msra.mxu1 %v524_v3 }
 0x153   : > { %930 = vmatpush.xpose.msra.mxu2 %v507_v6  ;;  %546 = vmatpush.xpose.msra.mxu0 %v507_v6 }
 0x154   : > { %946 = vmatpush.xpose.msra.mxu3 %v523_v7  ;;  %587 = vmatpush.xpose.msra.mxu1 %v523_v7 }
 0x157   : > { %931 = vmatpush.xpose.msra.mxu2 %v506_v11  ;;  %547 = vmatpush.xpose.msra.mxu0 %v506_v11 }
 0x158   : > { %947 = vmatpush.xpose.msra.mxu3 %v522_v12  ;;  %588 = vmatpush.xpose.msra.mxu1 %v522_v12 }
 0x15b   : > { %932 = vmatpush.xpose.msra.mxu2 %v505_v16  ;;  %548 = vmatpush.xpose.msra.mxu0 %v505_v16 }
 0x15c   : > { %948 = vmatpush.xpose.msra.mxu3 %v521_v17  ;;  %589 = vmatpush.xpose.msra.mxu1 %v521_v17 }
 0x15f   : > { %933 = vmatpush.xpose.msra.mxu2 %v504_v21  ;;  %549 = vmatpush.xpose.msra.mxu0 %v504_v21 }
 0x160   : > { %949 = vmatpush.xpose.msra.mxu3 %v520_v22  ;;  %590 = vmatpush.xpose.msra.mxu1 %v520_v22 }
 0x163   : > { %934 = vmatpush.xpose.msra.mxu2 %v503_v26  ;;  %550 = vmatpush.xpose.msra.mxu0 %v503_v26 }
 0x164   : > { %950 = vmatpush.xpose.msra.mxu3 %v519_v27  ;;  %591 = vmatpush.xpose.msra.mxu1 %v519_v27 }
 0x167   : > { %935 = vmatpush.xpose.msra.mxu2 %v502_v31  ;;  %551 = vmatpush.xpose.msra.mxu0 %v502_v31 }
 0x168   : > { %951 = vmatpush.xpose.msra.mxu3 %v518_v32  ;;  %592 = vmatpush.xpose.msra.mxu1 %v518_v32 }
 0x16b   : > { %936 = vmatpush.xpose.msra.mxu2 %v501_v36  ;;  %552 = vmatpush.xpose.msra.mxu0 %v501_v36 }
 0x16c   : > { %952 = vmatpush.xpose.msra.mxu3 %v517_v37  ;;  %593 = vmatpush.xpose.msra.mxu1 %v517_v37 }
 0x16f   : > { %937 = vmatpush.xpose.msra.mxu2 %v500_v39  ;;  %553 = vmatpush.xpose.msra.mxu0 %v500_v39 }
 0x170   : > { %953 = vmatpush.xpose.msra.mxu3 %v516_v40  ;;  %594 = vmatpush.xpose.msra.mxu1 %v516_v40 }
 0x172   : > { %566 = vmatmul.f32.vlgmr.msra.gmra.mxu2 %v1722_v9  ;;  %554 = vmatmul.f32.vlgmr.msra.gmra.mxu0 %v1727_v14 }
 0x173   : > { %607 = vmatmul.f32.vlgmr.msra.gmra.mxu3 %v1722_v9  ;;  %595 = vmatmul.f32.vlgmr.msra.gmra.mxu1 %v1727_v14 }
 0x17a   : > { %569 = vmatmul.f32.gmra.mxu2 %v1115_v19  ;;  %557 = vmatmul.f32.gmra.mxu0 %v1117_v24 }
 0x17b   : > { %610 = vmatmul.f32.gmra.mxu3 %v1115_v19  ;;  %598 = vmatmul.f32.gmra.mxu1 %v1117_v24 }
 0x182   : > { %572 = vmatmul.f32.gmra.mxu2 %v1119_v29  ;;  %560 = vmatmul.f32.gmra.mxu0 %v1121_v34 }
 0x183   : > { %613 = vmatmul.f32.gmra.mxu3 %v1119_v29  ;;  %601 = vmatmul.f32.gmra.mxu1 %v1121_v34 }
 0x18a   : > { %575 = vmatmul.f32.gmra.mxu2 %v1123_v38  ;;  %563 = vmatmul.f32.gmra.mxu0 %v1125_v41 }
 0x18b   : > { %616 = vmatmul.f32.gmra.mxu3 %v1123_v38  ;;  %604 = vmatmul.f32.gmra.mxu1 %v1125_v41 }
 0x1ef   : > { %v555_v45 = vpop.f32.mrf.mxu0 }
 0x1f0   : > { %v596_v46 = vpop.f32.mrf.mxu1  ;;  %v556_v47 = vadd.f32 %v555_v45, %v1749_v43 }
 0x1f1   : > { %v597_v48 = vadd.f32 %v596_v46, %v1751_v44 }
 0x1f2   : > { %1126 = vtanh.f32 %v556_v47 }
 0x1f3   : > { %1128 = vtanh.f32 %v597_v48 }
 0x1f5   : > { %v567_v49 = vpop.f32.mrf.mxu2 }
 0x1f6   : > { %v608_v50 = vpop.f32.mrf.mxu3  ;;  %v568_v51 = vadd.f32 %v567_v49, %v1749_v43 }
 0x1f7   : > { %v609_v52 = vadd.f32 %v608_v50, %v1751_v44  ;;  %v558_v53 = vpop.f32.mrf.mxu0 }
 0x1f8   : > { %1130 = vtanh.f32 %v568_v51  ;;  %v599_v54 = vpop.f32.mrf.mxu1  ;;  %v1127_v55 = vpop.eup %1126  ;;  %v559_v56 = vadd.f32 %v558_v53, %v1749_v43 }
 0x1f9   : > { %1132 = vtanh.f32 %v609_v52  ;;  %v600_v57 = vadd.f32 %v599_v54, %v1751_v44  ;;  %v1129_v58 = vpop.eup %1128  ;;  %636 = vst [vmem:[%s1687_s4] sm:$0xff] %v1127_v55 }
 0x1fa   : > { %637 = vst [vmem:[%s1687_s4 + $0x8] sm:$0xff] %v1129_v58  ;;  %1134 = vtanh.f32 %v559_v56 }
 0x1fb   : > { %1136 = vtanh.f32 %v600_v57 }
 0x1fd   : > { %v570_v59 = vpop.f32.mrf.mxu2 }
 0x1fe   : > { %v611_v60 = vpop.f32.mrf.mxu3  ;;  %v1131_v61 = vpop.eup %1130  ;;  %v571_v62 = vadd.f32 %v570_v59, %v1749_v43 }
 0x1ff   : > { %v612_v63 = vadd.f32 %v611_v60, %v1751_v44  ;;  %v1133_v0 = vpop.eup %1132  ;;  %644 = vst [vmem:[%s1687_s4 + $0x40] sm:$0xff] %v1131_v61  ;;  %v561_v1 = vpop.f32.mrf.mxu0 }
 0x200   : > { %645 = vst [vmem:[%s1687_s4 + $0x48] sm:$0xff] %v1133_v0  ;;  %1138 = vtanh.f32 %v571_v62  ;;  %v602_v2 = vpop.f32.mrf.mxu1  ;;  %v1135_v3 = vpop.eup %1134  ;;  %v562_v4 = vadd.f32 %v561_v1, %v1749_v43 }
 0x201   : > { %1140 = vtanh.f32 %v612_v63  ;;  %v603_v5 = vadd.f32 %v602_v2, %v1751_v44  ;;  %v1137_v6 = vpop.eup %1136  ;;  %638 = vst [vmem:[%s1687_s4 + $0x10] sm:$0xff] %v1135_v3 }
 0x202   : > { %639 = vst [vmem:[%s1687_s4 + $0x18] sm:$0xff] %v1137_v6  ;;  %1142 = vtanh.f32 %v562_v4 }
 0x203   : > { %1144 = vtanh.f32 %v603_v5 }
 0x205   : > { %v573_v7 = vpop.f32.mrf.mxu2 }
 0x206   : > { %v614_v8 = vpop.f32.mrf.mxu3  ;;  %v1139_v9 = vpop.eup %1138  ;;  %v574_v10 = vadd.f32 %v573_v7, %v1749_v43 }
 0x207   : > { %v615_v11 = vadd.f32 %v614_v8, %v1751_v44  ;;  %v1141_v12 = vpop.eup %1140  ;;  %646 = vst [vmem:[%s1687_s4 + $0x50] sm:$0xff] %v1139_v9  ;;  %v564_v13 = vpop.f32.mrf.mxu0 }
 0x208   : > { %647 = vst [vmem:[%s1687_s4 + $0x58] sm:$0xff] %v1141_v12  ;;  %1146 = vtanh.f32 %v574_v10  ;;  %v605_v14 = vpop.f32.mrf.mxu1  ;;  %v1143_v15 = vpop.eup %1142  ;;  %v565_v16 = vadd.f32 %v564_v13, %v1749_v43 }
 0x209   : > { %1148 = vtanh.f32 %v615_v11  ;;  %v606_v17 = vadd.f32 %v605_v14, %v1751_v44  ;;  %v1145_v18 = vpop.eup %1144  ;;  %640 = vst [vmem:[%s1687_s4 + $0x20] sm:$0xff] %v1143_v15 }
 0x20a   : > { %641 = vst [vmem:[%s1687_s4 + $0x28] sm:$0xff] %v1145_v18  ;;  %1150 = vtanh.f32 %v565_v16 }
 0x20b   : > { %1152 = vtanh.f32 %v606_v17 }
 0x20d   : > { %v576_v19 = vpop.f32.mrf.mxu2 }
 0x20e   : > { %v617_v20 = vpop.f32.mrf.mxu3  ;;  %v1147_v21 = vpop.eup %1146  ;;  %v577_v22 = vadd.f32 %v576_v19, %v1749_v43 }
 0x20f   : > { %v618_v23 = vadd.f32 %v617_v20, %v1751_v44  ;;  %v1149_v24 = vpop.eup %1148  ;;  %648 = vst [vmem:[%s1687_s4 + $0x60] sm:$0xff] %v1147_v21 }
 0x210   : > { %649 = vst [vmem:[%s1687_s4 + $0x68] sm:$0xff] %v1149_v24  ;;  %1154 = vtanh.f32 %v577_v22  ;;  %v1151_v25 = vpop.eup %1150 }
 0x211   : > { %1156 = vtanh.f32 %v618_v23  ;;  %v1153_v26 = vpop.eup %1152  ;;  %642 = vst [vmem:[%s1687_s4 + $0x30] sm:$0xff] %v1151_v25 }
 0x212   : > { %643 = vst [vmem:[%s1687_s4 + $0x38] sm:$0xff] %v1153_v26 }
 0x216   : > { %v1155_v27 = vpop.eup %1154 }
 0x217   : > { %v1157_v28 = vpop.eup %1156  ;;  %650 = vst [vmem:[%s1687_s4 + $0x70] sm:$0xff] %v1155_v27 }
 0x218   : > { %651 = vst [vmem:[%s1687_s4 + $0x78] sm:$0xff] %v1157_v28 }
 0x219 PF: > { %s1921_s21 = sld [smem:[#allocation20_spill]]  ;;  %s670_s5 = sshll.u32 %s1685_s7, 4  ;;  %s671_s5 = int_to_ptr.vmem [resolvable:$true] %s670_s5 }
 0x21a   : > { %s1923_s3 = sld [smem:[#allocation32_spill]]  ;;  %s653_s23 = scalar_lea.sflag [#allocation5], %s1681_s13 }
 0x21f   : > { %s871_s19 = sshll.u32 %s1921_s21, 6 }
 0x220   : > { %s669_s6 = scalar_lea.hbm %s1923_s3, %s871_s19  ;;  %s1268_s30 = scalar_lea.hbm %s1923_s3, 128 }
 0x221   : > { %s672_s0 = sshll.u32 %s669_s6, 4  ;;  %s673_s0 = int_to_ptr.hbm [resolvable:$true] %s672_s0 }
 0x222   : > { %s1262_s29 = sshra.s32 %s673_s0, 4  ;;  %s1263_s29 = int_to_ptr.hbm [resolvable:$true] %s1262_s29 }
 0x223   : > { %s1264_s15 = scalar_lea.hbm %s1263_s29, 64  ;;  %p1269_p11 = scmp.lt.s32.totalorder %s1263_s29, %s1923_s3 }
 0x224   : > { %p1265_p6 = scmp.ne.s32.totalorder %s1263_s29, %s1264_s15  ;;  %p1270_p0 = scmp.lt.s32.totalorder %s1268_s30, %s1264_s15 }
 0x226   : > { %p1266_p13 = pnand %p1265_p6, %p1570_p8  ;;  %p1271_p3 = por %p1270_p0, %p1269_p11 }
 0x228   : > { %p1267_p7 = pneg %p1266_p13 }
 0x22a   : > { %p1272_p5 = pnand %p1271_p3, %p1267_p7 }
 0x22c   : > { %1275 = shalt.err (!%p1272_p5)
}
 0x22d   : > { %s1441_s7 = smov 128   ;;  %s1442_s9 = smov 8  }
 0x22e   : > { %962 = dma.vmem_to_hbm [thread:$0]  (%p1570_p8), %s671_s5, 1024, %s673_s0, %s653_s23, %s1441_s7, %s1441_s7, %s1442_s9  }
 0x22f   : > { %s873_s20 = sshll.u32 %s1921_s21, 7  ;;  %s688_s18 = sshll.u32 %s1687_s4, 4  ;;  %s689_s18 = int_to_ptr.vmem [resolvable:$true] %s688_s18 }
 0x230   : > { %s1924_s27 = sld [smem:[#allocation33_spill]]  ;;  %s658_s15 = scalar_lea.sflag [#allocation11], %s1681_s13 }
 0x236   : > { %s1925_s6 = smov %s1924_s27  ;;  %s687_s17 = scalar_lea.hbm %s1924_s27, %s873_s20 }
 0x237   : > { %s690_s29 = sshll.u32 %s687_s17, 4  ;;  %s1296_s21 = scalar_lea.hbm %s1925_s6, 256  ;;  %s691_s29 = int_to_ptr.hbm [resolvable:$true] %s690_s29 }
 0x238   : > { %s1290_s16 = sshra.s32 %s691_s29, 4  ;;  %s1291_s16 = int_to_ptr.hbm [resolvable:$true] %s1290_s16 }
 0x239   : > { %s1292_s30 = scalar_lea.hbm %s1291_s16, 128  ;;  %p1297_p4 = scmp.lt.s32.totalorder %s1291_s16, %s1925_s6 }
 0x23a   : > { %p1293_p10 = scmp.ne.s32.totalorder %s1291_s16, %s1292_s30  ;;  %p1298_p1 = scmp.lt.s32.totalorder %s1296_s21, %s1292_s30 }
 0x23c   : > { %p1294_p2 = pnand %p1293_p10, %p1570_p8  ;;  %p1299_p6 = por %p1298_p1, %p1297_p4 }
 0x23e   : > { %p1295_p9 = pneg %p1294_p2 }
 0x240   : > { %p1300_p13 = pnand %p1299_p6, %p1295_p9 }
 0x242   : > { %1303 = shalt.err (!%p1300_p13)
}
 0x243   : > { %s1443_s13 = smov 256   ;;  %s1444_s0 = smov 16  }
 0x244   : > { %963 = dma.vmem_to_hbm [thread:$0]  (%p1570_p8), %s689_s18, 2048, %s691_s29, %s658_s15, %s1443_s13, %s1443_s13, %s1444_s0  }
 0x245 PF: > { %s1926_s23 = sld [smem:[#allocation17_spill]]  ;;  %p987_p7 = scmp.ge.s32.totalorder %s1434_s10, 2 }
 0x247   : > { %p978_p11 = pnand %p987_p7, %p1576_p12 }
 0x249   : > { %p979_p0 = pneg %p978_p11 }
 0x24b   : > { %s705_s9 = sand.u32 1, %s1926_s23  }
 0x24c   : > { %s706_s20 = scalar_lea.sflag [#allocation5], %s705_s9 }
 0x24d   : > { %1373 = dma.done.wait (%p979_p0), %s706_s20, 1024  }
 0x24e   : > { %1375 = vsyncadd (%p979_p0), %s706_s20, 4294966272  ;;  %s716_s19 = scalar_lea.sflag [#allocation11], %s705_s9 }
 0x24f   : > { %1377 = dma.done.wait (%p979_p0), %s716_s19, 2048  }
 0x250   : > { %1379 = vsyncadd (%p979_p0), %s716_s19, 4294965248  ;;  %s29_s10 = sadd.s32 1, %s1434_s10   ;;  %s1929_s18 = sld [smem:[#allocation18_spill]] }
 0x251   : > { %p1822_p3 = scmp.ge.s32.totalorder %s29_s10, 6   ;;  %s1930_s23 = sld [smem:[#allocation26_spill]] }
 0x252   : > { %s1931_s17 = sld [smem:[#allocation19_spill]]  ;;  %s1936_s21 = smov %s1386_s22 }
 0x253   : > { %s1932_s29 = sld [smem:[#allocation27_spill]]  ;;  %s1938_s24 = smov %s1398_s25 }
 0x254   : > { %s1933_s7 = sld [smem:[#allocation21_spill]]  ;;  %s1939_s25 = smov %s1402_s26 }
 0x255   : > { %s1934_s15 = sld [smem:[#allocation24_spill]]  ;;  %s1940_s26 = smov %s1646_s2 }
 0x256   : > { %s1935_s9 = sld [smem:[#allocation25_spill]]  ;;  %s1937_s22 = smov %s1929_s18 }
 0x257   : > { %s1941_s27 = smov %s1410_s28  ;;  %s1943_s30 = smov %s1426_s8 }
 0x258   : > { %s1942_s28 = smov %s1931_s17  ;;  %28 = sbr.rel (!%p1822_p3) target bundleno = 21 (0x15), region = 127 }
 0x25b   : > { %s1944_s8 = smov %s1934_s15 }
 0x25d   :  { %722 = vsyncpa [#allocation4], 1 }
 0x25e   :  { %724 = vsyncpa [#allocation4 + $0x1], 1 }
 0x25f   :  { %725 = vsyncpa [#allocation7], 1 }
 0x260   :  { %727 = vsyncpa [#allocation7 + $0x1], 1 }
 0x261   :  { %728 = vsyncpa [#allocation5], 1 }
 0x262   :  { %730 = vsyncpa [#allocation5 + $0x1], 1 }
 0x263   :  { %731 = vsyncpa [#allocation11], 1 }
 0x264   :  { %733 = vsyncpa [#allocation11 + $0x1], 1 }

</bundles_post_ra>
